<compile_context>
chip_gen: v6e
topology: v6e:2x2x1
jax: 0.10.0
libtpu: 0.0.40
codegen_flags: <defaults>
</compile_context>

<pallas_src>
import jax
import jax.numpy as jnp
from jax.experimental import pallas as pl
from jax.experimental.pallas import tpu as pltpu

N = 3
LEAKY_SLOPE = 0.01  # nn.LeakyReLU() default


def _round_up(n, m):
    return ((n + m - 1) // m) * m


def discrim_kernel(x_ref, w1_ref, b1_ref, w2_ref, b2_ref, w3_ref, b3_ref, o_ref):
    # fc1 + LeakyReLU   (bf16 matmul operands, f32 accumulation)
    x = x_ref[...].astype(jnp.bfloat16)
    h = jnp.dot(x, w1_ref[...], preferred_element_type=jnp.float32)
    h = h + b1_ref[...]
    h = jnp.maximum(h, LEAKY_SLOPE * h)
    # fc2 + LeakyReLU
    h = jnp.dot(h.astype(jnp.bfloat16), w2_ref[...],
                preferred_element_type=jnp.float32)
    h = h + b2_ref[...]
    h = jnp.maximum(h, LEAKY_SLOPE * h)
    # fc3 + Sigmoid
    h = jnp.dot(h.astype(jnp.bfloat16), w3_ref[...],
                preferred_element_type=jnp.float32)
    h = h + b3_ref[...]
    h = jnp.clip(h, -60.0, 60.0)          # avoid inf from exp(-h); sigmoid saturated anyway
    e = jnp.exp(-h)                       # EUP
    o_ref[...] = pl.reciprocal(1.0 + e, approx=True)  # EUP vrcp, keeps VALU free


def discrim_forward(x, params, *, block_b=1024):
    """x: (B, 2N) float32. params: dict of (in,out) weights and (1,out) biases.

    Batch-tiled pallas_call: weights stay resident in VMEM, batch tiles of
    `block_b` rows are streamed/pipelined through the 3-layer MLP.
    """
    # Weights cast to bf16 once on the host side (MXU-native; tiny arrays).
    w1 = params["w1"].astype(jnp.bfloat16)
    w2 = params["w2"].astype(jnp.bfloat16)
    w3 = params["w3"].astype(jnp.bfloat16)
    b1, b2, b3 = params["b1"], params["b2"], params["b3"]

    B, F = x.shape
    # Tile size: multiple of 8 (sublane), capped at block_b (~1-2K is good for
    # v7x's smaller VMEM, still fine on v5e/v6e).
    TB = min(block_b, _round_up(B, 8))
    Bp = _round_up(B, TB)
    if Bp != B:
        x = jnp.pad(x, ((0, Bp - B), (0, 0)))

    grid = (Bp // TB,)
    resident = lambda a: pl.BlockSpec(a.shape, lambda i: (0, 0))

    out = pl.pallas_call(
        discrim_kernel,
        out_shape=jax.ShapeDtypeStruct((Bp, 1), jnp.float32),
        grid=grid,
        in_specs=[
            pl.BlockSpec((TB, F), lambda i: (i, 0)),   # x: streamed per tile
            resident(w1), resident(b1),
            resident(w2), resident(b2),
            resident(w3), resident(b3),
        ],
        out_specs=pl.BlockSpec((TB, 1), lambda i: (i, 0)),
        compiler_params=pltpu.CompilerParams(
            dimension_semantics=("parallel",),
            vmem_limit_bytes=32 * 1024 * 1024,
        ),
    )(x, w1, b1, w2, b2, w3, b3)

    return out[:B]


def init_params(key, n=N):
    """Deterministic init mimicking PyTorch Linear (uniform(-1/sqrt(fan_in), +))."""
    ks = jax.random.split(key, 6)

    def linear(kw, kb, fan_in, fan_out):
        bound = 1.0 / jnp.sqrt(fan_in)
        w = jax.random.uniform(kw, (fan_in, fan_out), jnp.float32, -bound, bound)
        b = jax.random.uniform(kb, (1, fan_out), jnp.float32, -bound, bound)
        return w, b

    w1, b1 = linear(ks[0], ks[1], n * 2, 64)
    w2, b2 = linear(ks[2], ks[3], 64, 64)
    w3, b3 = linear(ks[4], ks[5], 64, 1)
    return {"w1": w1, "b1": b1, "w2": w2, "b2": b2, "w3": w3, "b3": b3}


def discrim_reference(x, p):
    def leaky(v):
        return jnp.where(v >= 0, v, LEAKY_SLOPE * v)
    h = leaky(x @ p["w1"] + p["b1"])
    h = leaky(h @ p["w2"] + p["b2"])
    h = h @ p["w3"] + p["b3"]
    return jax.nn.sigmoid(h)


if __name__ == "__main__":
    key = jax.random.PRNGKey(0)
    kx, kp, kx2 = jax.random.split(key, 3)
    params = init_params(kp, N)

    # Small case (single tile).
    batch = 8
    x = jax.random.normal(kx, (batch, N * 2), dtype=jnp.float32)
    out = jax.block_until_ready(discrim_forward(x, params))
    ref = discrim_reference(x, params)
    assert out.shape == (batch, 1)
    # bf16 matmul operands + approx reciprocal => slightly loose tolerance.
    assert jnp.allclose(out, ref, atol=2e-2, rtol=2e-2)

    # Larger, non-multiple-of-tile case to exercise padding + multi-step grid.
    batch2 = 300
    x2 = jax.random.normal(kx2, (batch2, N * 2), dtype=jnp.float32)
    out2 = jax.block_until_ready(discrim_forward(x2, params, block_b=128))
    ref2 = discrim_reference(x2, params)
    assert out2.shape == (batch2, 1)
    assert jnp.allclose(out2, ref2, atol=2e-2, rtol=2e-2)

    print("KERNEL_OK")
</pallas_src>

<mosaic_0001>
module attributes {stable_mosaic.version = 11 : i64} {
  func.func @discrim_kernel(%arg0: i32, %arg1: memref<8x6xf32, #tpu.memory_space<vmem>>, %arg2: memref<6x64xbf16, #tpu.memory_space<vmem>>, %arg3: memref<1x64xf32, #tpu.memory_space<vmem>>, %arg4: memref<64x64xbf16, #tpu.memory_space<vmem>>, %arg5: memref<1x64xf32, #tpu.memory_space<vmem>>, %arg6: memref<64x1xbf16, #tpu.memory_space<vmem>>, %arg7: memref<1x1xf32, #tpu.memory_space<vmem>>, %arg8: memref<8x1xf32, #tpu.memory_space<vmem>>) attributes {dimension_semantics = [#tpu.dimension_semantics<parallel>], iteration_bounds = array<i64: 1>, scalar_prefetch = 0 : i64, scratch_operands = 0 : i64, tpu.core_type = #tpu.core_type<tc>, window_params = [{transform_indices = @transform_0, window_bounds = array<i64: 8, 6>}, {pipeline_mode = #tpu.pipeline_mode<synchronous>, transform_indices = @transform_1, window_bounds = array<i64: 6, 64>}, {pipeline_mode = #tpu.pipeline_mode<synchronous>, transform_indices = @transform_2, window_bounds = array<i64: 1, 64>}, {pipeline_mode = #tpu.pipeline_mode<synchronous>, transform_indices = @transform_3, window_bounds = array<i64: 64, 64>}, {pipeline_mode = #tpu.pipeline_mode<synchronous>, transform_indices = @transform_4, window_bounds = array<i64: 1, 64>}, {pipeline_mode = #tpu.pipeline_mode<synchronous>, transform_indices = @transform_5, window_bounds = array<i64: 64, 1>}, {pipeline_mode = #tpu.pipeline_mode<synchronous>, transform_indices = @transform_6, window_bounds = array<i64: 1, 1>}, {transform_indices = @transform_7, window_bounds = array<i64: 8, 1>}]} {
    %c0 = arith.constant 0 : index
    %c0_0 = arith.constant 0 : index
    %0 = vector.load %arg1[%c0, %c0_0] : memref<8x6xf32, #tpu.memory_space<vmem>>, vector<8x6xf32>
    %1 = arith.truncf %0 : vector<8x6xf32> to vector<8x6xbf16>
    %c0_1 = arith.constant 0 : index
    %c0_2 = arith.constant 0 : index
    %2 = vector.load %arg2[%c0_1, %c0_2] : memref<6x64xbf16, #tpu.memory_space<vmem>>, vector<6x64xbf16>
    %cst = arith.constant dense<0.000000e+00> : vector<8x64xf32>
    %3 = tpu.matmul %1, %2, %cst {dimension_numbers = #tpu.dot_dimension_numbers<[1], [0], [0], [1], [0, 0, 1, 1], [], []>} : vector<8x6xbf16>, vector<6x64xbf16>, vector<8x64xf32> -> vector<8x64xf32>
    %c0_3 = arith.constant 0 : index
    %c0_4 = arith.constant 0 : index
    %4 = vector.load %arg3[%c0_3, %c0_4] : memref<1x64xf32, #tpu.memory_space<vmem>>, vector<1x64xf32>
    %5 = vector.broadcast %4 : vector<1x64xf32> to vector<8x64xf32>
    %6 = arith.addf %3, %5 : vector<8x64xf32>
    %cst_5 = arith.constant 0.00999999977 : f32
    %7 = vector.broadcast %cst_5 : f32 to vector<8x64xf32>
    %8 = arith.mulf %7, %6 : vector<8x64xf32>
    %9 = arith.maximumf %6, %8 : vector<8x64xf32>
    %10 = arith.truncf %9 : vector<8x64xf32> to vector<8x64xbf16>
    %c0_6 = arith.constant 0 : index
    %c0_7 = arith.constant 0 : index
    %11 = vector.load %arg4[%c0_6, %c0_7] : memref<64x64xbf16, #tpu.memory_space<vmem>>, vector<64x64xbf16>
    %cst_8 = arith.constant dense<0.000000e+00> : vector<8x64xf32>
    %12 = tpu.matmul %10, %11, %cst_8 {dimension_numbers = #tpu.dot_dimension_numbers<[1], [0], [0], [1], [0, 0, 1, 1], [], []>} : vector<8x64xbf16>, vector<64x64xbf16>, vector<8x64xf32> -> vector<8x64xf32>
    %c0_9 = arith.constant 0 : index
    %c0_10 = arith.constant 0 : index
    %13 = vector.load %arg5[%c0_9, %c0_10] : memref<1x64xf32, #tpu.memory_space<vmem>>, vector<1x64xf32>
    %14 = vector.broadcast %13 : vector<1x64xf32> to vector<8x64xf32>
    %15 = arith.addf %12, %14 : vector<8x64xf32>
    %cst_11 = arith.constant 0.00999999977 : f32
    %16 = vector.broadcast %cst_11 : f32 to vector<8x64xf32>
    %17 = arith.mulf %16, %15 : vector<8x64xf32>
    %18 = arith.maximumf %15, %17 : vector<8x64xf32>
    %19 = arith.truncf %18 : vector<8x64xf32> to vector<8x64xbf16>
    %c0_12 = arith.constant 0 : index
    %c0_13 = arith.constant 0 : index
    %20 = vector.load %arg6[%c0_12, %c0_13] : memref<64x1xbf16, #tpu.memory_space<vmem>>, vector<64x1xbf16>
    %cst_14 = arith.constant dense<0.000000e+00> : vector<8x1xf32>
    %21 = tpu.matmul %19, %20, %cst_14 {dimension_numbers = #tpu.dot_dimension_numbers<[1], [0], [0], [1], [0, 0, 1, 1], [], []>} : vector<8x64xbf16>, vector<64x1xbf16>, vector<8x1xf32> -> vector<8x1xf32>
    %c0_15 = arith.constant 0 : index
    %c0_16 = arith.constant 0 : index
    %22 = vector.load %arg7[%c0_15, %c0_16] : memref<1x1xf32, #tpu.memory_space<vmem>>, vector<1x1xf32>
    %23 = vector.broadcast %22 : vector<1x1xf32> to vector<8x1xf32>
    %24 = arith.addf %21, %23 : vector<8x1xf32>
    %cst_17 = arith.constant -6.000000e+01 : f32
    %cst_18 = arith.constant 6.000000e+01 : f32
    %25 = vector.broadcast %cst_17 : f32 to vector<8x1xf32>
    %26 = arith.maximumf %25, %24 : vector<8x1xf32>
    %27 = vector.broadcast %cst_18 : f32 to vector<8x1xf32>
    %28 = arith.minimumf %27, %26 : vector<8x1xf32>
    %cst_19 = arith.constant 0.000000e+00 : f32
    %29 = vector.broadcast %cst_19 : f32 to vector<8x1xf32>
    %30 = arith.subf %29, %28 : vector<8x1xf32>
    %31 = math.exp %30 : vector<8x1xf32>
    %cst_20 = arith.constant 1.000000e+00 : f32
    %32 = vector.broadcast %cst_20 : f32 to vector<8x1xf32>
    %33 = arith.addf %32, %31 : vector<8x1xf32>
    %34 = tpu.reciprocal %33 {approx = true} : vector<8x1xf32> -> vector<8x1xf32>
    %c0_21 = arith.constant 0 : index
    %c0_22 = arith.constant 0 : index
    %35 = vector.load %arg8[%c0_21, %c0_22] : memref<8x1xf32, #tpu.memory_space<vmem>>, vector<8x1xf32>
    tpu.vector_store %arg8[%c0_21, %c0_22], %34 {strides = array<i32>} : memref<8x1xf32, #tpu.memory_space<vmem>>, vector<8x1xf32>,
    return
  }
  func.func @transform_0(%arg0: i32) -> (i32, i32) {
    %c0_i32 = arith.constant 0 : i32
    %c0_i32_0 = arith.constant 0 : i32
    return %arg0, %c0_i32 : i32, i32
  }
  func.func @transform_1(%arg0: i32) -> (i32, i32) {
    %c0_i32 = arith.constant 0 : i32
    %c0_i32_0 = arith.constant 0 : i32
    %c0_i32_1 = arith.constant 0 : i32
    return %c0_i32, %c0_i32_0 : i32, i32
  }
  func.func @transform_2(%arg0: i32) -> (i32, i32) {
    %c0_i32 = arith.constant 0 : i32
    %c0_i32_0 = arith.constant 0 : i32
    %c0_i32_1 = arith.constant 0 : i32
    return %c0_i32, %c0_i32_0 : i32, i32
  }
  func.func @transform_3(%arg0: i32) -> (i32, i32) {
    %c0_i32 = arith.constant 0 : i32
    %c0_i32_0 = arith.constant 0 : i32
    %c0_i32_1 = arith.constant 0 : i32
    return %c0_i32, %c0_i32_0 : i32, i32
  }
  func.func @transform_4(%arg0: i32) -> (i32, i32) {
    %c0_i32 = arith.constant 0 : i32
    %c0_i32_0 = arith.constant 0 : i32
    %c0_i32_1 = arith.constant 0 : i32
    return %c0_i32, %c0_i32_0 : i32, i32
  }
  func.func @transform_5(%arg0: i32) -> (i32, i32) {
    %c0_i32 = arith.constant 0 : i32
    %c0_i32_0 = arith.constant 0 : i32
    %c0_i32_1 = arith.constant 0 : i32
    return %c0_i32, %c0_i32_0 : i32, i32
  }
  func.func @transform_6(%arg0: i32) -> (i32, i32) {
    %c0_i32 = arith.constant 0 : i32
    %c0_i32_0 = arith.constant 0 : i32
    %c0_i32_1 = arith.constant 0 : i32
    return %c0_i32, %c0_i32_0 : i32, i32
  }
  func.func @transform_7(%arg0: i32) -> (i32, i32) {
    %c0_i32 = arith.constant 0 : i32
    %c0_i32_0 = arith.constant 0 : i32
    return %arg0, %c0_i32 : i32, i32
  }
}

</mosaic_0001>

<bundles_post_ra>
// kernel: tpu_custom_call.1
= control target key start
LH: loop header
LB: loop body
LE: loop exit
PB: predicated region body
PF: predicated region fallthrough
CT: control target
= control target key end

     0   :  { %s505_s0 = inlined_call_operand.vmem [shape: f32[8,6], index: 0, kind: input, shape index: {}]   ;;  %s506_s1 = inlined_call_operand.hbm [shape: bf16[6,64], index: 1, kind: input, shape index: {}]   ;;  %s507_s2 = inlined_call_operand.hbm [shape: f32[1,64], index: 2, kind: input, shape index: {}]   ;;  %s508_s3 = inlined_call_operand.vmem [shape: bf16[64,64], index: 3, kind: input, shape index: {}]   ;;  %s509_s4 = inlined_call_operand.vmem [shape: f32[1,64], index: 4, kind: input, shape index: {}]   ;;  %s510_s5 = inlined_call_operand.vmem [shape: bf16[64,1], index: 5, kind: input, shape index: {}]   ;;  %s511_s6 = inlined_call_operand.<no memory space> [shape: f32[1,1], index: 6, kind: input, shape index: {}]   ;;  %s512_s7 = inlined_call_operand.vmem [shape: f32[8,1], index: 7, kind: output, shape index: {}]  }
   0x1   :  { %v12_v0 = vstv %s511_s6 }
   0x2   :  { %13 = vst [vmem:[#allocation2] sm:$0x1] %v12_v0 }
   0x3   :  { %14 = vsyncpa [#allocation4], 0 }
   0x4   :  { %15 = vsyncpa [#allocation6], 0  ;;  %s414_s26 = smov [#allocation3]   ;;  %s415_s28 = smov [#allocation5]  }
   0x5   :  { %s24_s27 = sshll.u32 %s414_s26, 4  ;;  %s34_s29 = sshll.u32 %s415_s28, 4  ;;  %s25_s27 = int_to_ptr.vmem [resolvable:$true] %s24_s27  ;;  %s35_s29 = int_to_ptr.vmem [resolvable:$true] %s34_s29 }
   0x6   :  { %s378_s30 = scalar_lea.vmem %s25_s27, 64  ;;  %p383_p1 = scmp.lt.s32.totalorder %s25_s27, %s25_s27 }
   0x7   :  { %p379_p0 = scmp.ne.s32.totalorder %s25_s27, %s378_s30  ;;  %p384_p2 = scmp.lt.s32.totalorder %s378_s30, %s378_s30 }
   0x9   :  { %p385_p3 = por %p384_p2, %p383_p1 }
   0xb   :  { %p386_p4 = pnand %p385_p3, %p379_p0 }
   0xd   :  { %389 = shalt.err (!%p386_p4)
}
   0xe   :  { %27 = dma.hbm_to_vmem [thread:$0]  %s506_s1, 64, %s25_s27, [#allocation4]  }
   0xf   :  { %s398_s6 = scalar_lea.vmem %s35_s29, 16  ;;  %s402_s10 = scalar_lea.vmem %s35_s29, 32 }
  0x10   :  { %p399_p5 = scmp.ne.s32.totalorder %s35_s29, %s398_s6  ;;  %p403_p6 = scmp.lt.s32.totalorder %s35_s29, %s35_s29 }
  0x11   :  { %p404_p7 = scmp.lt.s32.totalorder %s402_s10, %s398_s6 }
  0x13   :  { %p405_p8 = por %p404_p7, %p403_p6 }
  0x15   :  { %p406_p9 = pnand %p405_p8, %p399_p5 }
  0x17   :  { %409 = shalt.err (!%p406_p9)
}
  0x18   :  { %37 = dma.hbm_to_vmem [thread:$0]  %s507_s2, 16, %s35_s29, [#allocation6]  }
  0x19   :  { %410 = dma.done.wait [#allocation4], 64  }
  0x1a   :  { %411 = vsyncadd [#allocation4], 4294967232 }
  0x1b   :  { %412 = dma.done.wait [#allocation6], 16  }
  0x1c   :  { %413 = vsyncadd [#allocation6], 4294967280  ;;  %v416_v1 = vmov 0.0   ;;  %vm417_vm0 = vmmov 0   ;;  %vm67_vm1 = vcmask 1042432   ;;  %v53_v3 = vld [vmem:[%s505_s0] sm:$0xff] }
  0x1d   :  { %324 = vmatprep.subr.bf16.mxu0 %v416_v1  ;;  %326 = vmatprep.mubr.msk.bf16.mxu0 %vm417_vm0, %v416_v1  ;;  %v55_v2 = vld [vmem:[#allocation3] sm:$0x7]  ;;  %v54_v5 = vpack.c.bf16 %v53_v3, %v53_v3  ;;  %v358_v6 = vld [vmem:[%s508_s3 + $0x18] sm:$0xff]   ;;  %vm63_vm2 = vcmask 48128   ;;  %v359_v7 = vld [vmem:[%s508_s3 + $0x10] sm:$0xff]   ;;  %vm153_vm3 = vcmask 523264  }
  0x1e   :  { %330 = vmatprep.subr.bf16.mxu1 %v416_v1  ;;  %338 = vmatprep.mubr.msk.bf16.mxu1 %vm417_vm0, %v416_v1  ;;  %v69_v4 = vsel %vm67_vm1, %v55_v2, 0  ;;  %v360_v8 = vld [vmem:[%s508_s3 + $0x8] sm:$0xff]   ;;  %v361_v9 = vld [vmem:[%s508_s3] sm:$0xff]   ;;  %v362_v10 = vld [vmem:[%s510_s5 + $0x18] sm:$0xff]   ;;  %vm289_vm4 = vcmask 7168  }
  0x1f   :  { %325 = vmatpush3.bf16.msra.mxu0 %v69_v4  ;;  %331 = vmatpush3.bf16.msra.mxu1 %v358_v6  ;;  %v363_v11 = vld [vmem:[%s510_s5 + $0x10] sm:$0xff]   ;;  %v297_v12 = vld [vmem:[#allocation5] ss:$0 sm:$0xff]  ;;  %v364_v21 = vld [vmem:[%s510_s5 + $0x8] sm:$0xff]  }
  0x20   :  { %342 = vmatprep.subr.bf16.mxu0 %v416_v1  ;;  %332 = vmatprep.subr.bf16.mxu1 %v416_v1  ;;  %v365_v22 = vld [vmem:[%s510_s5] sm:$0xff]  }
  0x21   :  { %v299_v23 = vld [vmem:[%s509_s4] ss:$0 sm:$0xff] }
  0x22   :  { %327 = vmatmul.mubr.msk.bf16.vlgmr.msra.gmra.mxu0 %vm63_vm2, %v54_v5  ;;  %v305_v32 = vld [vmem:[#allocation2] ss:$0 sm:$0xff] }
  0x23   :  { %350 = vmatprep.mubr.msk.bf16.mxu0 %vm417_vm0, %v416_v1  ;;  %333 = vmatpush3.bf16.msra.mxu1 %v359_v7 }
  0x24   :  { %334 = vmatprep.subr.bf16.mxu1 %v416_v1  ;;  %343 = vmatpush3.bf16.msra.mxu0 %v362_v10 }
  0x25   :  { %344 = vmatprep.subr.bf16.mxu0 %v416_v1 }
  0x27   :  { %335 = vmatpush3.bf16.msra.mxu1 %v360_v8 }
  0x28   :  { %336 = vmatprep.subr.bf16.mxu1 %v416_v1  ;;  %345 = vmatpush3.bf16.msra.mxu0 %v363_v11 }
  0x29   :  { %346 = vmatprep.subr.bf16.mxu0 %v416_v1 }
  0x2b   :  { %337 = vmatpush3.bf16.msra.mxu1 %v361_v9 }
  0x2c   :  { %347 = vmatpush3.bf16.msra.mxu0 %v364_v21 }
  0x2d   :  { %348 = vmatprep.subr.bf16.mxu0 %v416_v1 }
  0x30   :  { %349 = vmatpush3.bf16.msra.mxu0 %v365_v22 }
  0xe2   :  { %v105_v13 = vpop.f32.mrf.mxu0 }
  0xe3   :  { %v106_v14 = vadd.f32 %v297_v12, %v105_v13 }
  0xe4   :  { %v328_v15 = vpop.f32.mrf.mxu0 }
  0xe5   :  { %v111_v16 = vmul.f32 0.01, %v106_v14 }
  0xe6   :  { %v108_v17 = vpop.f32.mrf.mxu0 }
  0xe7   :  { %v112_v18 = vmax.f32 %v106_v14, %v111_v16 }
  0xe8   :  { %v329_v19 = vpop.f32.mrf.mxu0 }
  0xe9   :  { %v113_v20 = vpack.c.bf16 %v112_v18, %v112_v18 }
  0xeb   :  { %339 = vmatmul.mubr.msk.bf16.vlgmr.msra.gmra.mxu1 %vm153_vm3, %v113_v20 }
 0x1ab   :  { %v191_v24 = vpop.f32.mrf.mxu1 }
 0x1ac   :  { %v192_v25 = vadd.f32 %v299_v23, %v191_v24 }
 0x1ad   :  { %v340_v26 = vpop.f32.mrf.mxu1 }
 0x1ae   :  { %v197_v27 = vmul.f32 0.01, %v192_v25 }
 0x1af   :  { %v194_v28 = vpop.f32.mrf.mxu1 }
 0x1b0   :  { %v198_v29 = vmax.f32 %v192_v25, %v197_v27 }
 0x1b1   :  { %v341_v30 = vpop.f32.mrf.mxu1 }
 0x1b2   :  { %v199_v31 = vpack.c.bf16 %v198_v29, %v198_v29 }
 0x1b4   :  { %351 = vmatmul.mubr.msk.bf16.vlgmr.msra.gmra.mxu0 %vm153_vm3, %v199_v31 }
 0x274   :  { %v276_v33 = vpop.f32.mrf.mxu0 }
 0x275   :  { %v277_v34 = vadd.f32 %v305_v32, %v276_v33 }
 0x276   :  { %v352_v35 = vpop.f32.mrf.mxu0 }
 0x277   :  { %v311_v36 = vclamps-f32 %v277_v34, 60.0 }
 0x278   :  { %v279_v37 = vpop.f32.mrf.mxu0 }
 0x279   :  { %v284_v38 = vsub.f32 0.0, %v311_v36 }
 0x27a   :  { %v353_v39 = vpop.f32.mrf.mxu0 }
 0x27b   :  { %v285_v40 = vmul.f32 1.442695, %v284_v38 }
 0x27d   :  { %366 = vpow2.f32 %v285_v40 }
 0x28a   :  { %v367_v41 = vpop.eup %366 }
 0x28b   :  { %v287_v42 = vadd.f32 1.0, %v367_v41 }
 0x28d   :  { %368 = vrcp.f32 %v287_v42 }
 0x29a   :  { %v369_v43 = vpop.eup %368 }
 0x29b   :  { %290 = vst.msk [vmem:[%s512_s7] sm:$0xff] %vm289_vm4, %v369_v43 }
 0x29c   :  { %295 = vsyncpa [#allocation4], 1 }
 0x29d   :  { %296 = vsyncpa [#allocation6], 1 }

</bundles_post_ra>
